<compile_context>
chip_gen: v6e
topology: v6e:2x2x1
jax: 0.10.0
libtpu: 0.0.40
codegen_flags: <defaults>
</compile_context>

<pallas_src>
import functools
import math

import jax
import jax.numpy as jnp
from jax.experimental import pallas as pl
from jax.experimental.pallas import tpu as pltpu


# ----------------------------------------------------------------------------
# Kernel
# ----------------------------------------------------------------------------
def _pos_enc_kernel(x_ref, inv_freq_ref, phase_ref, pos_off_ref, o_ref, *, rows_per):
    # x_ref / o_ref: (tq, tc) lane-dense tiles of the (R, L) view of x.
    # inv_freq_ref:  (1, tc)  exp(-2*floor((col % d)/2) * ln(10000)/d)
    # phase_ref:     (1, tc)  pi/2 on cos (odd-feature) columns, else 0
    # pos_off_ref:   (1, tc)  col // (batch*d)   (0 everywhere when L == batch*d)
    # rows_per:      python int, sequence positions packed per flat row (L // C)
    tq = x_ref.shape[0]

    row = jax.lax.broadcasted_iota(jnp.int32, (tq, 1), 0)
    base = (pl.program_id(0) * tq + row) * rows_per                  # (tq, 1) int32
    pos = base.astype(jnp.float32) + pos_off_ref[...]                # (tq, tc)

    # One transcendental per element: sin(theta + pi/2) == cos(theta) exactly.
    pe = jnp.sin(pos * inv_freq_ref[...] + phase_ref[...])           # (tq, tc) f32

    x = x_ref[...]
    if o_ref.dtype == jnp.float32:
        o_ref[...] = x + pe
    else:
        # Cast pe once; do the add in the input dtype (bf16 VPU on v6e/v7x).
        o_ref[...] = x + pe.astype(o_ref.dtype)


# ----------------------------------------------------------------------------
# Tiling helpers
# ----------------------------------------------------------------------------
_TARGET_BLOCK_BYTES = 2 * 1024 * 1024   # ~2 MiB blocks: at the measured BW plateau
_VMEM_LIMIT_BYTES = 40 * 1024 * 1024    # > every default scoped limit, < v7x 64 MiB/TC


def _choose_tiles(R: int, L: int, dtype_bytes: int, sublane: int):
    """Pick (row_tile, lane_tile) for the (R, L) view."""
    # Lane tile: largest of {2048,1024,512,256,128} that divides L (no masked
    # lane stores); if L is not 128-aligned, take the whole (full-dim) axis.
    if L % 128 == 0:
        tc = 128
        for cand in (2048, 1024, 512, 256):
            if L % cand == 0:
                tc = cand
                break
    else:
        tc = L
    # Row tile: ~2 MiB per block, rounded to the dtype's sublane multiple.
    rows = max(sublane, _TARGET_BLOCK_BYTES // max(tc * dtype_bytes, 1))
    rows = (rows // sublane) * sublane
    tq = min(R, rows)
    # Keep >= 4 row-grid steps when R allows, so each v7x TensorCore gets >= 2
    # pipelined steps (DMA/compute overlap per core).
    if R >= 4 * sublane and pl.cdiv(R, tq) < 4:
        tq = max(sublane, (pl.cdiv(R, 4) // sublane) * sublane)
    if tq >= R:
        tq = R
    return tq, tc


# ----------------------------------------------------------------------------
# Wrapper (== module.forward)
# ----------------------------------------------------------------------------
def positional_encoding(x: jnp.ndarray, max_len: int, *, row_tile=None) -> jnp.ndarray:
    """x: [seq, batch, d_model] -> x + pe[:seq] (pe as built by the module)."""
    seq, batch, d = x.shape
    assert seq <= max_len, "PositionalEncoding: sequence length exceeds max_len"

    C = batch * d
    dtype_bytes = jnp.dtype(x.dtype).itemsize
    sublane = max(8, 32 // dtype_bytes)          # 8 f32 / 16 bf16 / 32 int8-fp8

    # Pick a lane-dense 2-D view (R, L) of x (contiguous reshape: free).
    if C % 128 == 0:
        R, L = seq, C
    else:
        Lf = (C * 128) // math.gcd(C, 128)       # lcm(C, 128): 128-aligned lanes
        if seq % (Lf // C) == 0 and Lf <= 32768:
            R, L = (seq * C) // Lf, Lf           # flatten seq into the lane axis
        else:
            R, L = seq, C                        # fallback: full-width (masked) stores
    rows_per = L // C                            # sequence positions per flat row

    # Tiny per-column constants (never the pe table itself).
    col = jnp.arange(L, dtype=jnp.int32)
    j = col % d                                  # feature index of this column
    k2 = ((j // 2) * 2).astype(jnp.float32)
    inv_freq = jnp.exp(k2 * (-math.log(10000.0) / d))[None, :]
    phase = jnp.where((j % 2) == 1,
                      jnp.float32(math.pi / 2.0), jnp.float32(0.0))[None, :]
    pos_off = (col // C).astype(jnp.float32)[None, :]

    tq, tc = _choose_tiles(R, L, dtype_bytes, sublane)
    if row_tile is not None:                     # test hook (partial-tile coverage)
        tq = int(row_tile)
    grid = (pl.cdiv(R, tq), pl.cdiv(L, tc))

    x2 = x.reshape(R, L)
    kernel = functools.partial(_pos_enc_kernel, rows_per=rows_per)

    out2 = pl.pallas_call(
        kernel,
        out_shape=jax.ShapeDtypeStruct((R, L), x.dtype),
        grid=grid,
        in_specs=[
            pl.BlockSpec((tq, tc), lambda i, jg: (i, jg)),
            pl.BlockSpec((1, tc), lambda i, jg: (0, jg)),   # tiny constants
            pl.BlockSpec((1, tc), lambda i, jg: (0, jg)),
            pl.BlockSpec((1, tc), lambda i, jg: (0, jg)),
        ],
        out_specs=pl.BlockSpec((tq, tc), lambda i, jg: (i, jg)),
        compiler_params=pltpu.CompilerParams(
            dimension_semantics=("parallel", "parallel"),
            vmem_limit_bytes=_VMEM_LIMIT_BYTES,
        ),
    )(x2, inv_freq, phase, pos_off)

    return out2.reshape(seq, batch, d)


# ----------------------------------------------------------------------------
# Reference (mirrors the PyTorch __init__ buffer construction exactly)
# ----------------------------------------------------------------------------
def _build_pe_reference(d_model: int, max_len: int) -> jnp.ndarray:
    position = jnp.arange(max_len, dtype=jnp.float32)[:, None]
    div_term = jnp.exp(
        jnp.arange(0, d_model, 2, dtype=jnp.float32) * (-math.log(10000.0) / d_model)
    )
    pe = jnp.zeros((max_len, 1, d_model), jnp.float32)
    pe = pe.at[:, 0, 0::2].set(jnp.sin(position * div_term))
    pe = pe.at[:, 0, 1::2].set(jnp.cos(position * div_term))
    return pe


if __name__ == "__main__":
    # --- Test 1: module-scale demo shape (seq=8, batch=2, d_model=32, C=64) ---
    # Exercises the flattened lane-dense path (L = lcm(64, 128) = 128).
    seq, batch, d_model, max_len = 8, 2, 32, 16
    x = jax.random.normal(jax.random.PRNGKey(0), (seq, batch, d_model), jnp.float32)
    out = jax.block_until_ready(positional_encoding(x, max_len=max_len))
    ref = x + _build_pe_reference(d_model, max_len)[:seq]
    assert out.shape == x.shape
    assert jnp.allclose(out, ref, atol=1e-4, rtol=1e-4), "mismatch (test 1)"

    # --- Test 2: 128-aligned C with a forced PARTIAL last row tile -----------
    # (seq=24, row_tile=16 -> grid=2, last block half out of bounds; this is
    # the padded-block path the review flagged as untested.)
    seq2, batch2, d2, max_len2 = 24, 2, 64, 32
    x2 = jax.random.normal(jax.random.PRNGKey(1), (seq2, batch2, d2), jnp.float32)
    out2 = jax.block_until_ready(positional_encoding(x2, max_len=max_len2, row_tile=16))
    ref2 = x2 + _build_pe_reference(d2, max_len2)[:seq2]
    assert jnp.allclose(out2, ref2, atol=1e-4, rtol=1e-4), "mismatch (test 2)"

    # --- Test 3: bf16 input (pe computed f32, cast once, add in bf16) --------
    seq3, batch3, d3, max_len3 = 16, 2, 64, 32
    x3 = jax.random.normal(jax.random.PRNGKey(2), (seq3, batch3, d3), jnp.bfloat16)
    out3 = jax.block_until_ready(positional_encoding(x3, max_len=max_len3))
    ref3 = x3 + _build_pe_reference(d3, max_len3)[:seq3].astype(jnp.bfloat16)
    assert jnp.allclose(out3.astype(jnp.float32), ref3.astype(jnp.float32),
                        atol=5e-2), "mismatch (test 3)"

    print("KERNEL_OK")
</pallas_src>

<mosaic_0001>
module attributes {stable_mosaic.version = 11 : i64} {
  func.func @_pos_enc_kernel(%arg0: i32, %arg1: i32, %arg2: memref<4x128xf32, #tpu.memory_space<vmem>>, %arg3: memref<1x128xf32, #tpu.memory_space<vmem>>, %arg4: memref<1x128xf32, #tpu.memory_space<vmem>>, %arg5: memref<1x128xf32, #tpu.memory_space<vmem>>, %arg6: memref<4x128xf32, #tpu.memory_space<vmem>>) attributes {dimension_semantics = [#tpu.dimension_semantics<parallel>, #tpu.dimension_semantics<parallel>], iteration_bounds = array<i64: 1, 1>, scalar_prefetch = 0 : i64, scratch_operands = 0 : i64, tpu.core_type = #tpu.core_type<tc>, window_params = [{transform_indices = @transform_0, window_bounds = array<i64: 4, 128>}, {transform_indices = @transform_1, window_bounds = array<i64: 1, 128>}, {transform_indices = @transform_2, window_bounds = array<i64: 1, 128>}, {transform_indices = @transform_3, window_bounds = array<i64: 1, 128>}, {transform_indices = @transform_4, window_bounds = array<i64: 4, 128>}]} {
    %0 = tpu.iota {dimensions = array<i32: 0>} : vector<4x1xi32>
    %c4_i32 = arith.constant 4 : i32
    %1 = arith.muli %arg0, %c4_i32 : i32
    %2 = vector.broadcast %1 : i32 to vector<4x1xi32>
    %3 = arith.addi %2, %0 : vector<4x1xi32>
    %c2_i32 = arith.constant 2 : i32
    %4 = vector.broadcast %c2_i32 : i32 to vector<4x1xi32>
    %5 = arith.muli %3, %4 : vector<4x1xi32>
    %6 = arith.sitofp %5 : vector<4x1xi32> to vector<4x1xf32>
    %c0 = arith.constant 0 : index
    %c0_0 = arith.constant 0 : index
    %7 = vector.load %arg5[%c0, %c0_0] : memref<1x128xf32, #tpu.memory_space<vmem>>, vector<1x128xf32>
    %8 = vector.broadcast %6 : vector<4x1xf32> to vector<4x128xf32>
    %9 = vector.broadcast %7 : vector<1x128xf32> to vector<4x128xf32>
    %10 = arith.addf %8, %9 : vector<4x128xf32>
    %c0_1 = arith.constant 0 : index
    %c0_2 = arith.constant 0 : index
    %11 = vector.load %arg3[%c0_1, %c0_2] : memref<1x128xf32, #tpu.memory_space<vmem>>, vector<1x128xf32>
    %12 = vector.broadcast %11 : vector<1x128xf32> to vector<4x128xf32>
    %13 = arith.mulf %10, %12 : vector<4x128xf32>
    %c0_3 = arith.constant 0 : index
    %c0_4 = arith.constant 0 : index
    %14 = vector.load %arg4[%c0_3, %c0_4] : memref<1x128xf32, #tpu.memory_space<vmem>>, vector<1x128xf32>
    %15 = vector.broadcast %14 : vector<1x128xf32> to vector<4x128xf32>
    %16 = arith.addf %13, %15 : vector<4x128xf32>
    %17 = math.sin %16 : vector<4x128xf32>
    %c0_5 = arith.constant 0 : index
    %c0_6 = arith.constant 0 : index
    %18 = vector.load %arg2[%c0_5, %c0_6] : memref<4x128xf32, #tpu.memory_space<vmem>>, vector<4x128xf32>
    %19 = arith.addf %18, %17 : vector<4x128xf32>
    %c0_7 = arith.constant 0 : index
    %c0_8 = arith.constant 0 : index
    %20 = vector.load %arg6[%c0_7, %c0_8] : memref<4x128xf32, #tpu.memory_space<vmem>>, vector<4x128xf32>
    tpu.vector_store %arg6[%c0_7, %c0_8], %19 {strides = array<i32>} : memref<4x128xf32, #tpu.memory_space<vmem>>, vector<4x128xf32>,
    return
  }
  func.func @transform_0(%arg0: i32, %arg1: i32) -> (i32, i32) {
    %c0_i32 = arith.constant 0 : i32
    return %arg0, %arg1 : i32, i32
  }
  func.func @transform_1(%arg0: i32, %arg1: i32) -> (i32, i32) {
    %c0_i32 = arith.constant 0 : i32
    %c0_i32_0 = arith.constant 0 : i32
    return %c0_i32, %arg1 : i32, i32
  }
  func.func @transform_2(%arg0: i32, %arg1: i32) -> (i32, i32) {
    %c0_i32 = arith.constant 0 : i32
    %c0_i32_0 = arith.constant 0 : i32
    return %c0_i32, %arg1 : i32, i32
  }
  func.func @transform_3(%arg0: i32, %arg1: i32) -> (i32, i32) {
    %c0_i32 = arith.constant 0 : i32
    %c0_i32_0 = arith.constant 0 : i32
    return %c0_i32, %arg1 : i32, i32
  }
  func.func @transform_4(%arg0: i32, %arg1: i32) -> (i32, i32) {
    %c0_i32 = arith.constant 0 : i32
    return %arg0, %arg1 : i32, i32
  }
}

</mosaic_0001>

<bundles_post_ra>
// kernel: tpu_custom_call.1
= control target key start
LH: loop header
LB: loop body
LE: loop exit
PB: predicated region body
PF: predicated region fallthrough
CT: control target
= control target key end

     0   :  { %9 = vsyncpa [#allocation3], 0  ;;  %s319_s0 = inlined_call_operand.hbm [shape: f32[4,128], index: 0, kind: input, shape index: {}]   ;;  %s320_s1 = inlined_call_operand.vmem [shape: f32[1,128], index: 1, kind: input, shape index: {}]   ;;  %s321_s2 = inlined_call_operand.vmem [shape: f32[1,128], index: 2, kind: input, shape index: {}]   ;;  %s322_s3 = inlined_call_operand.vmem [shape: f32[1,128], index: 3, kind: input, shape index: {}]   ;;  %s323_s4 = inlined_call_operand.hbm [shape: f32[4,128], index: 4, kind: output, shape index: {}]  }
   0x1   :  { %10 = vsyncpa [#allocation4], 0  ;;  %s250_s15 = smov [#allocation2]  }
   0x2   :  { %s17_s16 = sshll.u32 %s250_s15, 4  ;;  %s18_s16 = int_to_ptr.vmem [resolvable:$true] %s17_s16 }
   0x3   :  { %s214_s17 = scalar_lea.vmem %s18_s16, 64  ;;  %p219_p1 = scmp.lt.s32.totalorder %s18_s16, %s18_s16 }
   0x4   :  { %p215_p0 = scmp.ne.s32.totalorder %s18_s16, %s214_s17  ;;  %p220_p2 = scmp.lt.s32.totalorder %s214_s17, %s214_s17 }
   0x6   :  { %p221_p3 = por %p220_p2, %p219_p1 }
   0x8   :  { %p222_p4 = pnand %p221_p3, %p215_p0 }
   0xa   :  { %225 = shalt.err (!%p222_p4)
}
   0xb   :  { %20 = dma.hbm_to_vmem [thread:$0]  %s319_s0, 64, %s18_s16, [#allocation3]  }
   0xc   :  { %246 = dma.done.wait [#allocation3], 64  }
   0xd   :  { %247 = vsyncadd [#allocation3], 4294967232  ;;  %v30_v0 = vlaneseq  ;;  %v183_v4 = vld [vmem:[%s322_s3] ss:$0 sm:$0xff]  ;;  %v251_v21 = vmov 683565275  }
   0xe   :  { %v184_v5 = vld [vmem:[%s320_s1] ss:$0 sm:$0xff]  ;;  %v252_v23 = vmov 2475754826   ;;  %v253_v25 = vmov 2131351028  }
   0xf   :  { %v31_v1 = vshrl.u32 %v30_v0, 7  ;;  %v185_v7 = vld [vmem:[%s321_s2] ss:$0 sm:$0xff]  ;;  %v254_v27 = vmov 2102212464   ;;  %s257_s0 = smov [#allocation5]  }
  0x10   :  { %v255_v29 = vmov 920167782   ;;  %v256_v36 = vmov 1326507024   ;;  %s174_s1 = sshll.u32 %s257_s0, 4  ;;  %s175_s1 = int_to_ptr.vmem [resolvable:$true] %s174_s1 }
  0x11   :  { %v35_v2 = vmul.u32 2, %v31_v1  ;;  %s226_s2 = scalar_lea.vmem %s175_s1, 64  ;;  %p231_p6 = scmp.lt.s32.totalorder %s175_s1, %s175_s1 }
  0x12   :  { %p227_p5 = scmp.ne.s32.totalorder %s175_s1, %s226_s2  ;;  %p232_p7 = scmp.lt.s32.totalorder %s226_s2, %s226_s2 }
  0x13   :  { %v36_v3 = vcvt.s32.f32 %v35_v2 }
  0x14   :  { %p233_p8 = por %p232_p7, %p231_p6 }
  0x15   :  { %v44_v6 = vadd.f32 %v183_v4, %v36_v3 }
  0x16   :  { %p234_p9 = pnand %p233_p8, %p227_p5 }
  0x17   :  { %v52_v8 = vmul.f32 %v184_v5, %v44_v6 }
  0x19   :  { %v295_v9 = vadd.f32 %v185_v7, %v52_v8 }
  0x1b   :  { %v64_v10 = vand.u32 2139095040, %v295_v9  ;;  %v61_v12 = vand.u32 2147483647, %v295_v9  ;;  %vm63_vm7 = vcmp.lt.s32.totalorder %v295_v9, 0  ;;  %vm153_vm12 = vweird.f32 %v295_v9 }
  0x1d   :  { %v65_v11 = vshrl.u32 %v64_v10, 23  ;;  %v68_v15 = vand.u32 8388607, %v61_v12  ;;  %vm62_vm8 = vcmp.le.f32.partialorder %v61_v12, 0.7853982 }
  0x1f   :  { %v186_v13 = vadd.s32 4294967169, %v65_v11  ;;  %v69_v18 = vor.u32 8388608, %v68_v15 }
  0x21   :  { %v71_v14 = vadd.s32 1, %v186_v13  ;;  %v109_v38 = vshll.u32 %v69_v18, 8 }
  0x23   :  { %vm72_vm0 = vcmp.gt.s32.totalorder %v71_v14, 0 }
  0x24   :  { %v73_v16 = vsel %vm72_vm0, %v71_v14, 0 }
  0x25   :  { %v75_v17 = vand.u32 31, %v73_v16  ;;  %v74_v19 = vshrl.u32 %v73_v16, 5 }
  0x27   :  { %v76_v20 = vsub.s32 32, %v75_v17  ;;  %v78_v22 = vshll.u32 %v251_v21, %v75_v17  ;;  %v81_v24 = vshll.u32 %v252_v23, %v75_v17  ;;  %v84_v26 = vshll.u32 %v253_v25, %v75_v17 }
  0x28   :  { %v87_v28 = vshll.u32 %v254_v27, %v75_v17  ;;  %v90_v30 = vshll.u32 %v255_v29, %v75_v17  ;;  %vm93_vm1 = vcmp.lt.s32.totalorder %v74_v19, 1  ;;  %vm96_vm2 = vcmp.lt.s32.totalorder %v74_v19, 4 }
  0x29   :  { %v77_v31 = vshrl.u32 %v251_v21, %v76_v20  ;;  %v79_v32 = vshrl.u32 %v252_v23, %v76_v20  ;;  %v82_v33 = vshrl.u32 %v253_v25, %v76_v20  ;;  %v85_v34 = vshrl.u32 %v254_v27, %v76_v20 }
  0x2a   :  { %v88_v35 = vshrl.u32 %v255_v29, %v76_v20  ;;  %v91_v37 = vshrl.u32 %v256_v36, %v76_v20  ;;  %vm94_vm3 = vcmp.lt.s32.totalorder %v74_v19, 2  ;;  %vm95_vm4 = vcmp.lt.s32.totalorder %v74_v19, 3  ;;  %v165_v36 = vld [vmem:[#allocation2] sm:$0xf] }
  0x2b   :  { %v80_v39 = vor.u32 %v79_v32, %v78_v22  ;;  %v83_v40 = vor.u32 %v82_v33, %v81_v24  ;;  %v86_v41 = vor.u32 %v85_v34, %v84_v26 }
  0x2c   :  { %v89_v42 = vor.u32 %v88_v35, %v87_v28  ;;  %v92_v43 = vor.u32 %v91_v37, %v90_v30 }
  0x2d   :  { %v97_v44 = vsel %vm93_vm1, %v77_v31, %v80_v39  ;;  %v98_v45 = vsel %vm96_vm2, %v86_v41, 2102212464  ;;  %v101_v46 = vsel %vm93_vm1, %v80_v39, %v83_v40  ;;  %v105_v47 = vsel %vm93_vm1, %v83_v40, %v86_v41 }
  0x2e   :  { %v99_v48 = vsel %vm95_vm4, %v83_v40, %v98_v45  ;;  %v102_v49 = vsel %vm96_vm2, %v89_v42, 920167782  ;;  %v106_v50 = vsel %vm96_vm2, %v92_v43, 1326507024 }
  0x2f   :  { %v103_v51 = vsel %vm95_vm4, %v86_v41, %v102_v49  ;;  %v107_v52 = vsel %vm95_vm4, %v89_v42, %v106_v50  ;;  %v100_v53 = vsel %vm94_vm3, %v97_v44, %v99_v48 }
  0x30   :  { %v104_v54 = vsel %vm94_vm3, %v101_v46, %v103_v51  ;;  %v108_v55 = vsel %vm94_vm3, %v105_v47, %v107_v52  ;;  %v116_v60 = vmul.u32 %v109_v38, %v100_v53 }
  0x31   :  { %v301_v56 = vmul.u32.u64.low %v109_v38, %v108_v55  ;;  %v302_v57 = vmul.u32.u64.high %v109_v38, %v108_v55, %v301_v56  ;;  %v304_v58 = vmul.u32.u64.low %v109_v38, %v104_v54  ;;  %v305_v59 = vmul.u32.u64.high %v109_v38, %v104_v54, %v304_v58 }
  0x33   :  { %vm118_vm5 = vc.u32 %v302_v57, %v304_v58  ;;  %v119_v61 = vadd.s32 1, %v305_v59  ;;  %v117_v8 = vadd.s32 %v304_v58, %v302_v57 }
  0x35   :  { %v120_v62 = vsel %vm118_vm5, %v119_v61, %v305_v59 }
  0x36   :  { %v121_v63 = vadd.s32 %v120_v62, %v116_v60 }
  0x38   :  { %v122_v0 = vadd.s32 536870912, %v121_v63 }
  0x3a   :  { %v123_v1 = vshrl.u32 %v122_v0, 30 }
  0x3c   :  { %v124_v2 = vshll.u32 %v123_v1, 30  ;;  %v147_v23 = vsub.s32 4, %v123_v1 }
  0x3e   :  { %v125_v3 = vsub.s32 %v121_v63, %v124_v2  ;;  %v148_v26 = vsel %vm63_vm7, %v147_v23, %v123_v1 }
  0x3f   :  { %v150_v28 = vsel %vm62_vm8, 0, %v148_v26 }
  0x40   :  { %v127_v4 = vsub.s32 0, %v125_v3  ;;  %v154_v29 = vadd.s32 3, %v150_v28 }
  0x42   :  { %v187_v5 = vmin.u32 %v127_v4, %v125_v3  ;;  %v155_v30 = vand.u32 3, %v154_v29 }
  0x44   :  { %v129_v6 = vclz %v187_v5  ;;  %vm160_vm9 = vcmp.eq.s32.totalorder %v155_v30, 2  ;;  %vm157_vm10 = vcmp.eq.s32.totalorder %v155_v30, 0  ;;  %vm156_vm11 = vcmp.lt.s32.totalorder %v155_v30, 2 }
  0x46   :  { %v188_v7 = vadd.s32 4294967294, %v129_v6 }
  0x48   :  { %vm189_vm6 = vcmp.lt.s32.totalorder %v188_v7, 0 }
  0x49   :  { %v132_v10 = vsel %vm189_vm6, 0, %v188_v7 }
  0x4a   :  { %v133_v11 = vsub.s32 32, %v132_v10  ;;  %v134_v13 = vshll.u32 %v125_v3, %v132_v10  ;;  %v137_v14 = vsub.s32 4294967266, %v132_v10 }
  0x4c   :  { %v135_v15 = vshrl.u32 %v117_v8, %v133_v11  ;;  %v138_v16 = vadd.s32 127, %v137_v14 }
  0x4e   :  { %v136_v17 = vor.u32 %v135_v15, %v134_v13  ;;  %v139_v18 = vshll.u32 %v138_v16, 23 }
  0x50   :  { %v140_v19 = vor.u32 4788187, %v139_v18  ;;  %v143_v20 = vcvt.s32.f32 %v136_v17 }
  0x52   :  { %v141_v21 = vand.u32 2147483647, %v140_v19 }
  0x54   :  { %v144_v22 = vmul.f32 %v143_v20, %v141_v21 }
  0x56   :  { %v145_v24 = vxor.u32 2147483648, %v144_v22 }
  0x58   :  { %v146_v25 = vsel %vm63_vm7, %v145_v24, %v144_v22 }
  0x59   :  { %v149_v27 = vsel %vm62_vm8, %v295_v9, %v146_v25 }
  0x5a   :  { %202 = vcosq.f32 %v149_v27 }
  0x5b   :  { %204 = vsinq.f32 %v149_v27 }
  0x67   :  { %v203_v31 = vpop.eup %202 }
  0x68   :  { %v205_v32 = vpop.eup %204  ;;  %v161_v33 = vxor.u32 2147483648, %v203_v31 }
  0x69   :  { %v158_v34 = vxor.u32 2147483648, %v205_v32 }
  0x6a   :  { %v162_v12 = vsel %vm160_vm9, %v161_v33, %v205_v32 }
  0x6b   :  { %v159_v35 = vsel %vm157_vm10, %v203_v31, %v158_v34 }
  0x6c   :  { %v163_v37 = vsel %vm156_vm11, %v159_v35, %v162_v12 }
  0x6d   :  { %v164_v38 = vsel %vm153_vm12, nan, %v163_v37 }
  0x6e   :  { %v166_v39 = vadd.f32 %v165_v36, %v164_v38 }
  0x70   :  { %167 = vst [vmem:[#allocation5] sm:$0xf] %v166_v39 }
  0x71   :  { %237 = shalt.err (!%p234_p9)
}
  0x72   :  { %177 = dma.vmem_to_hbm [thread:$0]  %s175_s1, 64, %s323_s4, [#allocation4]  }
  0x73   :  { %248 = dma.done.wait [#allocation4], 64  }
  0x74   :  { %249 = vsyncadd [#allocation4], 4294967232 }
  0x75   :  { %181 = vsyncpa [#allocation3], 1 }
  0x76   :  { %182 = vsyncpa [#allocation4], 1 }

</bundles_post_ra>
